<compile_context>
chip_gen: v7x
topology: tpu7x:2x2x1
jax: 0.10.0
libtpu: 0.0.40
codegen_flags: <defaults>
</compile_context>

<pallas_src>
import functools

import jax
import jax.numpy as jnp
from jax import lax
from jax.experimental import pallas as pl
from jax.experimental.pallas import tpu as pltpu


def _build_stacked(x_ref, stacked_ref, *, ks, dil, pad, L, lane_aligned):
    """Fill the (ks*Cin, L) scratch with circularly rotated copies of x.

    Row block k satisfies stacked[k*Cin + c, l] = x[c, (l + k*dil - pad) % L],
    so the dilated circular conv becomes one matmul against the flattened
    (Cout, ks*Cin) weight.  Built once per batch row (amortized over L tiles).
    """
    x2d = x_ref[0]
    slabs = []
    for k in range(ks):
        s = (k * dil - pad) % L                 # static circular shift
        if s == 0:
            xk = x2d
        elif lane_aligned:
            # XLU lane rotation (jnp.roll semantics): result[:, l] = x[:, (l + s) % L].
            xk = pltpu.roll(x2d, shift=L - s, axis=1)
        else:
            # Fallback for L not a multiple of 128: static slices + concat.
            xk = jnp.concatenate([x2d[:, s:], x2d[:, :s]], axis=-1)
        slabs.append(xk)
    stacked_ref[...] = jnp.concatenate(slabs, axis=0).astype(stacked_ref.dtype)


def _tile_offset(j, T):
    off = j * T
    if T % 128 == 0:
        off = pl.multiple_of(off, 128)          # aligned lane-offset hint
    return off


def _conv_relu_tile(stacked_ref, wflat_ref, b_ref, off, T):
    """ReLU(circular dilated conv + bias) for one L tile: (Cout, T) in f32."""
    xs = stacked_ref[:, pl.ds(off, T)]
    acc = jnp.dot(wflat_ref[...], xs, preferred_element_type=jnp.float32)
    return jnp.maximum(acc + b_ref[...], 0.0)


def _stats_kernel(x_ref, wflat_ref, b_ref, sum_ref, ssq_ref, stacked_ref,
                  *, ks, dil, pad, L, T, lane_aligned):
    # x_ref: (1, Cin, L)  wflat_ref: (Cout, ks*Cin)  b_ref: (Cout, 1)
    # sum_ref/ssq_ref: (1, Cout, 1) per-batch-row partials (resident across j)
    j = pl.program_id(1)

    @pl.when(j == 0)
    def _():
        _build_stacked(x_ref, stacked_ref, ks=ks, dil=dil, pad=pad, L=L,
                       lane_aligned=lane_aligned)
        sum_ref[...] = jnp.zeros_like(sum_ref)
        ssq_ref[...] = jnp.zeros_like(ssq_ref)

    off = _tile_offset(j, T)
    r = _conv_relu_tile(stacked_ref, wflat_ref, b_ref, off, T)
    sum_ref[...] += jnp.sum(r, axis=-1, keepdims=True)[None]
    ssq_ref[...] += jnp.sum(r * r, axis=-1, keepdims=True)[None]


def _apply_kernel(x_ref, wflat_ref, b_ref, rw_ref, scale_ref, shift_ref,
                  out_ref, stacked_ref, *, ks, dil, pad, L, T, lane_aligned):
    # out_ref: (1, Cout, T); scale/shift fold BN (+ residual bias) per channel.
    j = pl.program_id(1)

    @pl.when(j == 0)
    def _():
        _build_stacked(x_ref, stacked_ref, ks=ks, dil=dil, pad=pad, L=L,
                       lane_aligned=lane_aligned)

    off = _tile_offset(j, T)
    r = _conv_relu_tile(stacked_ref, wflat_ref, b_ref, off, T)
    x_tile = x_ref[0, :, pl.ds(off, T)].astype(jnp.float32)
    res = jnp.dot(rw_ref[...], x_tile, preferred_element_type=jnp.float32)
    out_ref[0] = (r * scale_ref[...] + res + shift_ref[...]).astype(out_ref.dtype)


def _pick_l_tile(L, max_l_tile):
    """Largest 128-multiple tile <= max_l_tile that divides L (else one tile)."""
    if L % 128 != 0:
        return L, False
    t = min(max(128, (max_l_tile // 128) * 128), L)
    while L % t:
        t -= 128
    return t, True


def cdil_block(x_ncl, w_v, w_g, b, rw, rb, gamma, beta, *, ks, pad, dil,
               eps=1e-5, l_tile=512, mxu_dtype=jnp.float32, out_dtype=None,
               vmem_limit_bytes=64 * 1024 * 1024):
    """x_ncl: (N, Cin, L) in PyTorch Conv1d layout. Returns (N, Cout, L).

    l_tile / vmem_limit_bytes should be sized per generation:
      v5e/v6e (128 MiB VMEM): raise the limit and use 512-1024 wide tiles.
      v7x (64 MiB VMEM): keep the limit <= ~48 MiB and tiles moderate.
    mxu_dtype=jnp.bfloat16 halves x/weight VMEM+DMA on v6e/v7x (f32 accum kept).
    """
    N, Cin, L = x_ncl.shape
    Cout = w_v.shape[0]
    out_dtype = x_ncl.dtype if out_dtype is None else out_dtype
    T, lane_aligned = _pick_l_tile(L, l_tile)
    J = L // T

    # weight_norm: W = g * v / ||v|| (norm over (Cin, ks) per out channel),
    # flattened so the ks taps become a single contraction of size ks*Cin.
    norm = jnp.sqrt(jnp.sum(w_v * w_v, axis=(1, 2), keepdims=True))
    w_eff = w_g.reshape(Cout, 1, 1) * w_v / norm                    # (Cout, Cin, ks)
    w_flat = jnp.transpose(w_eff, (0, 2, 1)).reshape(Cout, ks * Cin).astype(mxu_dtype)
    b_col = b.reshape(Cout, 1).astype(jnp.float32)

    kstat = functools.partial(_stats_kernel, ks=ks, dil=dil, pad=pad, L=L, T=T,
                              lane_aligned=lane_aligned)
    kapply = functools.partial(_apply_kernel, ks=ks, dil=dil, pad=pad, L=L, T=T,
                               lane_aligned=lane_aligned)

    x_spec = pl.BlockSpec((1, Cin, L), lambda n, j: (n, 0, 0))      # revisited over j
    wflat_spec = pl.BlockSpec((Cout, ks * Cin), lambda n, j: (0, 0))
    col_spec = pl.BlockSpec((Cout, 1), lambda n, j: (0, 0))
    stat_spec = pl.BlockSpec((1, Cout, 1), lambda n, j: (n, 0, 0))  # per-row partial
    scratch = [pltpu.VMEM((ks * Cin, L), mxu_dtype)]                # stacked rotated x
    cparams = pltpu.CompilerParams(
        dimension_semantics=("parallel", "arbitrary"),              # N parallel (megacore),
        vmem_limit_bytes=vmem_limit_bytes)                          # L-tiles carry scratch/acc

    # ---- pass 1: per-(row, channel) sum / sum-of-squares of ReLU(conv(x)).
    sums, ssqs = pl.pallas_call(
        kstat,
        grid=(N, J),
        in_specs=[x_spec, wflat_spec, col_spec],
        out_specs=(stat_spec, stat_spec),
        out_shape=(jax.ShapeDtypeStruct((N, Cout, 1), jnp.float32),
                   jax.ShapeDtypeStruct((N, Cout, 1), jnp.float32)),
        scratch_shapes=scratch,
        compiler_params=cparams,
    )(x_ncl, w_flat, b_col)

    # ---- tiny (Cout,) BN math; fold BN + residual bias into one scale/shift.
    cnt = float(N * L)
    r_sum = jnp.sum(sums, axis=0)                                   # (Cout, 1)
    r_ssq = jnp.sum(ssqs, axis=0)
    mean = r_sum / cnt
    var = jnp.maximum(r_ssq / cnt - mean * mean, 0.0)               # biased var (training)
    scale = gamma.reshape(Cout, 1) * lax.rsqrt(var + eps)
    shift = beta.reshape(Cout, 1) - mean * scale + rb.reshape(Cout, 1)

    # ---- pass 2: normalize + 1x1 residual conv, lane-dense (1, Cout, T) tiles.
    out = pl.pallas_call(
        kapply,
        grid=(N, J),
        in_specs=[x_spec, wflat_spec, col_spec,
                  pl.BlockSpec((Cout, Cin), lambda n, j: (0, 0)),
                  col_spec, col_spec],
        out_specs=pl.BlockSpec((1, Cout, T), lambda n, j: (n, 0, j)),
        out_shape=jax.ShapeDtypeStruct((N, Cout, L), out_dtype),
        scratch_shapes=scratch,
        compiler_params=cparams,
    )(x_ncl, w_flat, b_col, rw.astype(jnp.float32), scale, shift)
    return out


def reference(x, w_eff, b, rw, rb, gamma, beta, *, pad, dil, eps=1e-5):
    """Pure-JAX reference of the PyTorch forward (NCL layout)."""
    N, Cin, L = x.shape
    Cout, _, ks = w_eff.shape
    hp = jax.lax.Precision.HIGHEST
    xp = jnp.concatenate([x[..., L - pad:], x, x[..., :pad]], axis=-1)
    y = jnp.zeros((N, Cout, L), jnp.float32)
    for k in range(ks):
        y = y + jnp.einsum('oc,ncl->nol', w_eff[:, :, k],
                           xp[:, :, k * dil:k * dil + L], precision=hp)
    y = y + b[None, :, None]
    r = jnp.maximum(y, 0.0)
    mean = jnp.mean(r, axis=(0, 2), keepdims=True)
    var = jnp.mean((r - mean) ** 2, axis=(0, 2), keepdims=True)
    bn = gamma[None, :, None] * (r - mean) * lax.rsqrt(var + eps) + beta[None, :, None]
    res = jnp.einsum('oc,ncl->nol', rw, x, precision=hp) + rb[None, :, None]
    return bn + res


if __name__ == "__main__":
    # Small shapes consistent with the module: BN(num_features=32) => c_out = 32.
    # L = 256 with l_tile = 128 exercises the lane-aligned, multi-tile path.
    N, Cin, Cout, L = 2, 4, 32, 256
    ks, dil = 3, 2
    pad = dil * (ks - 1) // 2                                       # 'same' circular conv

    key = jax.random.PRNGKey(0)
    kx, kw, kb, krw, krb = jax.random.split(key, 5)

    x = jax.random.normal(kx, (N, Cin, L), jnp.float32)

    # Deterministic parameter init (shapes from __init__); normal(0, 0.01) like the module.
    w_v = 0.01 * jax.random.normal(kw, (Cout, Cin, ks), jnp.float32)   # weight_norm "v"
    w_g = jnp.sqrt(jnp.sum(w_v * w_v, axis=(1, 2)))                    # weight_norm "g" = ||v||
    b = 0.01 * jax.random.normal(kb, (Cout,), jnp.float32)
    rw = 0.01 * jax.random.normal(krw, (Cout, Cin), jnp.float32)       # 1x1 res conv weight
    rb = 0.01 * jax.random.normal(krb, (Cout,), jnp.float32)
    gamma = jnp.ones((Cout,), jnp.float32)                             # BN defaults
    beta = jnp.zeros((Cout,), jnp.float32)

    out = cdil_block(x, w_v, w_g, b, rw, rb, gamma, beta,
                     ks=ks, pad=pad, dil=dil, l_tile=128)
    out = jax.block_until_ready(out)

    # Correctness check against pure-JAX reference of the PyTorch forward.
    norm = jnp.sqrt(jnp.sum(w_v * w_v, axis=(1, 2), keepdims=True))
    w_eff = w_g.reshape(Cout, 1, 1) * w_v / norm
    ref = reference(x, w_eff, b, rw, rb, gamma, beta, pad=pad, dil=dil)
    assert out.shape == (N, Cout, L)
    assert jnp.allclose(out, ref, rtol=2e-3, atol=2e-3), "mismatch vs reference"

    print("KERNEL_OK")
</pallas_src>

<mosaic_0001>
module attributes {stable_mosaic.version = 11 : i64} {
  func.func @_stats_kernel(%arg0: i32, %arg1: i32, %arg2: memref<1x4x256xf32, #tpu.memory_space<vmem>>, %arg3: memref<32x12xf32, #tpu.memory_space<vmem>>, %arg4: memref<32x1xf32, #tpu.memory_space<vmem>>, %arg5: memref<1x32x1xf32, #tpu.memory_space<vmem>>, %arg6: memref<1x32x1xf32, #tpu.memory_space<vmem>>, %arg7: memref<12x256xf32, #tpu.memory_space<vmem>>) attributes {dimension_semantics = [#tpu.dimension_semantics<parallel>, #tpu.dimension_semantics<arbitrary>], iteration_bounds = array<i64: 2, 2>, scalar_prefetch = 0 : i64, scratch_operands = 1 : i64, tpu.core_type = #tpu.core_type<tc>, window_params = [{transform_indices = @transform_0, window_bounds = array<i64: 1, 4, 256>}, {pipeline_mode = #tpu.pipeline_mode<synchronous>, transform_indices = @transform_1, window_bounds = array<i64: 32, 12>}, {pipeline_mode = #tpu.pipeline_mode<synchronous>, transform_indices = @transform_2, window_bounds = array<i64: 32, 1>}, {transform_indices = @transform_3, window_bounds = array<i64: 1, 32, 1>}, {transform_indices = @transform_4, window_bounds = array<i64: 1, 32, 1>}]} {
    %c0_i32 = arith.constant 0 : i32
    %0 = arith.cmpi eq, %arg1, %c0_i32 : i32
    %1 = arith.extui %0 : i1 to i32
    %c0_i32_0 = arith.constant 0 : i32
    %2 = arith.cmpi ne, %1, %c0_i32_0 : i32
    scf.if %2 {
      %c0_20 = arith.constant 0 : index
      %c0_21 = arith.constant 0 : index
      %c0_22 = arith.constant 0 : index
      %27 = vector.load %arg2[%c0_20, %c0_21, %c0_22] : memref<1x4x256xf32, #tpu.memory_space<vmem>>, vector<1x4x256xf32>
      %28 = vector.shape_cast %27 : vector<1x4x256xf32> to vector<4x256xf32>
      %c2_i32 = arith.constant 2 : i32
      %29 = tpu.dynamic_rotate %28 by %c2_i32 dim 1 : vector<4x256xf32>, i32 -> vector<4x256xf32>
      %c254_i32 = arith.constant 254 : i32
      %30 = tpu.dynamic_rotate %28 by %c254_i32 dim 1 : vector<4x256xf32>, i32 -> vector<4x256xf32>
      %31 = tpu.concatenate %29, %28, %30 in 0 : vector<4x256xf32>, vector<4x256xf32>, vector<4x256xf32> -> vector<12x256xf32>
      %c0_23 = arith.constant 0 : index
      %c0_24 = arith.constant 0 : index
      %32 = vector.load %arg7[%c0_23, %c0_24] : memref<12x256xf32, #tpu.memory_space<vmem>>, vector<12x256xf32>
      tpu.vector_store %arg7[%c0_23, %c0_24], %31 {strides = array<i32>} : memref<12x256xf32, #tpu.memory_space<vmem>>, vector<12x256xf32>,
      %cst_25 = arith.constant 0.000000e+00 : f32
      %33 = vector.broadcast %cst_25 : f32 to vector<1x32x1xf32>
      %c0_26 = arith.constant 0 : index
      %c0_27 = arith.constant 0 : index
      %c0_28 = arith.constant 0 : index
      %34 = vector.load %arg5[%c0_26, %c0_27, %c0_28] : memref<1x32x1xf32, #tpu.memory_space<vmem>>, vector<1x32x1xf32>
      tpu.vector_store %arg5[%c0_26, %c0_27, %c0_28], %33 {strides = array<i32>} : memref<1x32x1xf32, #tpu.memory_space<vmem>>, vector<1x32x1xf32>,
      %cst_29 = arith.constant 0.000000e+00 : f32
      %35 = vector.broadcast %cst_29 : f32 to vector<1x32x1xf32>
      %c0_30 = arith.constant 0 : index
      %c0_31 = arith.constant 0 : index
      %c0_32 = arith.constant 0 : index
      %36 = vector.load %arg6[%c0_30, %c0_31, %c0_32] : memref<1x32x1xf32, #tpu.memory_space<vmem>>, vector<1x32x1xf32>
      tpu.vector_store %arg6[%c0_30, %c0_31, %c0_32], %35 {strides = array<i32>} : memref<1x32x1xf32, #tpu.memory_space<vmem>>, vector<1x32x1xf32>,
    } else {
    }
    %c128_i32 = arith.constant 128 : i32
    %3 = arith.muli %arg1, %c128_i32 : i32
    %4 = tpu.assume_multiple %3, 128 : i32
    %c0 = arith.constant 0 : index
    %5 = arith.index_cast %4 : i32 to index
    %6 = vector.load %arg7[%c0, %5] : memref<12x256xf32, #tpu.memory_space<vmem>>, vector<12x128xf32>
    %c0_1 = arith.constant 0 : index
    %c0_2 = arith.constant 0 : index
    %7 = vector.load %arg3[%c0_1, %c0_2] : memref<32x12xf32, #tpu.memory_space<vmem>>, vector<32x12xf32>
    %cst = arith.constant dense<0.000000e+00> : vector<32x128xf32>
    %8 = tpu.matmul %7, %6, %cst {dimension_numbers = #tpu.dot_dimension_numbers<[1], [0], [0], [1], [0, 0, 1, 1], [], []>} : vector<32x12xf32>, vector<12x128xf32>, vector<32x128xf32> -> vector<32x128xf32>
    %c0_3 = arith.constant 0 : index
    %c0_4 = arith.constant 0 : index
    %9 = vector.load %arg4[%c0_3, %c0_4] : memref<32x1xf32, #tpu.memory_space<vmem>>, vector<32x1xf32>
    %10 = vector.broadcast %9 : vector<32x1xf32> to vector<32x128xf32>
    %11 = arith.addf %8, %10 : vector<32x128xf32>
    %cst_5 = arith.constant 0.000000e+00 : f32
    %12 = vector.broadcast %cst_5 : f32 to vector<32x128xf32>
    %13 = arith.maximumf %11, %12 : vector<32x128xf32>
    %c0_6 = arith.constant 0 : index
    %c0_7 = arith.constant 0 : index
    %c0_8 = arith.constant 0 : index
    %14 = vector.load %arg5[%c0_6, %c0_7, %c0_8] : memref<1x32x1xf32, #tpu.memory_space<vmem>>, vector<1x32x1xf32>
    %cst_9 = arith.constant dense<0.000000e+00> : vector<32xf32>
    %15 = vector.multi_reduction <add>, %13, %cst_9 [1] : vector<32x128xf32> to vector<32xf32>
    %16 = vector.shape_cast %15 : vector<32xf32> to vector<32x1xf32>
    %17 = vector.shape_cast %16 : vector<32x1xf32> to vector<1x32x1xf32>
    %18 = arith.addf %14, %17 : vector<1x32x1xf32>
    %c0_10 = arith.constant 0 : index
    %c0_11 = arith.constant 0 : index
    %c0_12 = arith.constant 0 : index
    %19 = vector.load %arg5[%c0_10, %c0_11, %c0_12] : memref<1x32x1xf32, #tpu.memory_space<vmem>>, vector<1x32x1xf32>
    tpu.vector_store %arg5[%c0_10, %c0_11, %c0_12], %18 {strides = array<i32>} : memref<1x32x1xf32, #tpu.memory_space<vmem>>, vector<1x32x1xf32>,
    %c0_13 = arith.constant 0 : index
    %c0_14 = arith.constant 0 : index
    %c0_15 = arith.constant 0 : index
    %20 = vector.load %arg6[%c0_13, %c0_14, %c0_15] : memref<1x32x1xf32, #tpu.memory_space<vmem>>, vector<1x32x1xf32>
    %21 = arith.mulf %13, %13 : vector<32x128xf32>
    %cst_16 = arith.constant dense<0.000000e+00> : vector<32xf32>
    %22 = vector.multi_reduction <add>, %21, %cst_16 [1] : vector<32x128xf32> to vector<32xf32>
    %23 = vector.shape_cast %22 : vector<32xf32> to vector<32x1xf32>
    %24 = vector.shape_cast %23 : vector<32x1xf32> to vector<1x32x1xf32>
    %25 = arith.addf %20, %24 : vector<1x32x1xf32>
    %c0_17 = arith.constant 0 : index
    %c0_18 = arith.constant 0 : index
    %c0_19 = arith.constant 0 : index
    %26 = vector.load %arg6[%c0_17, %c0_18, %c0_19] : memref<1x32x1xf32, #tpu.memory_space<vmem>>, vector<1x32x1xf32>
    tpu.vector_store %arg6[%c0_17, %c0_18, %c0_19], %25 {strides = array<i32>} : memref<1x32x1xf32, #tpu.memory_space<vmem>>, vector<1x32x1xf32>,
    return
  }
  func.func @transform_0(%arg0: i32, %arg1: i32) -> (i32, i32, i32) {
    %c0_i32 = arith.constant 0 : i32
    %c0_i32_0 = arith.constant 0 : i32
    %c0_i32_1 = arith.constant 0 : i32
    return %arg0, %c0_i32, %c0_i32_0 : i32, i32, i32
  }
  func.func @transform_1(%arg0: i32, %arg1: i32) -> (i32, i32) {
    %c0_i32 = arith.constant 0 : i32
    %c0_i32_0 = arith.constant 0 : i32
    %c0_i32_1 = arith.constant 0 : i32
    return %c0_i32, %c0_i32_0 : i32, i32
  }
  func.func @transform_2(%arg0: i32, %arg1: i32) -> (i32, i32) {
    %c0_i32 = arith.constant 0 : i32
    %c0_i32_0 = arith.constant 0 : i32
    %c0_i32_1 = arith.constant 0 : i32
    return %c0_i32, %c0_i32_0 : i32, i32
  }
  func.func @transform_3(%arg0: i32, %arg1: i32) -> (i32, i32, i32) {
    %c0_i32 = arith.constant 0 : i32
    %c0_i32_0 = arith.constant 0 : i32
    %c0_i32_1 = arith.constant 0 : i32
    return %arg0, %c0_i32, %c0_i32_0 : i32, i32, i32
  }
  func.func @transform_4(%arg0: i32, %arg1: i32) -> (i32, i32, i32) {
    %c0_i32 = arith.constant 0 : i32
    %c0_i32_0 = arith.constant 0 : i32
    %c0_i32_1 = arith.constant 0 : i32
    return %arg0, %c0_i32, %c0_i32_0 : i32, i32, i32
  }
}

</mosaic_0001>

<bundles_post_ra>
// kernel: tpu_custom_call.1
= control target key start
LH: loop header
LB: loop body
LE: loop exit
PB: predicated region body
PF: predicated region fallthrough
CT: control target
= control target key end

     0   :  { %s1456_s0 = inlined_call_operand.hbm [shape: f32[2,4,256], index: 0, kind: input, shape index: {}]   ;;  %s1457_s1 = inlined_call_operand.hbm [shape: f32[32,12], index: 1, kind: input, shape index: {}]   ;;  %s1458_s2 = inlined_call_operand.hbm [shape: f32[32,1], index: 2, kind: input, shape index: {}]   ;;  %s1459_s3 = inlined_call_operand.hbm [shape: f32[2,32,1], index: 3, kind: output, shape index: {0}]   ;;  %s1460_s4 = inlined_call_operand.hbm [shape: f32[2,32,1], index: 4, kind: output, shape index: {1}]  }
   0x1   :  { %1466 = sst [smem:[#allocation17_spill]] %s1457_s1 }
   0x2   :  { %10 = vsyncpa [#allocation4], 0 }
   0x3   :  { %12 = vsyncpa [#allocation4 + $0x1], 0 }
   0x4   :  { %13 = vsyncpa [#allocation7], 0 }
   0x5   :  { %14 = vsyncpa [#allocation5], 0 }
   0x6   :  { %16 = vsyncpa [#allocation5 + $0x1], 0 }
   0x7   :  { %17 = vsyncpa [#allocation11], 0 }
   0x8   :  { %19 = vsyncpa [#allocation11 + $0x1], 0  ;;  %s1102_s15 = smov 0   ;;  %s1104_s16 = smov 0  }
   0x9   :  { %s1106_s17 = smov 0   ;;  %s1108_s18 = smov 0  }
   0xa   :  { %s1110_s19 = smov 0   ;;  %s1112_s20 = smov 0  }
   0xb   :  { %s1114_s21 = smov 0   ;;  %s1116_s22 = smov 0  }
   0xc LB: > { %s666_s23 = sadd.s32 4294967295, %s1061_s22   ;;  %s667_s24 = sadd.s32 4294967294, %s1061_s22   ;;  %s1061_s22 = sphi %s1116_s22, %s25_s22   ;;  %s1057_s21 = sphi %s1114_s21, %s1490_s21   ;;  %s1053_s20 = sphi %s1112_s20, %s1489_s20   ;;  %s1049_s19 = sphi %s1110_s19, %s1488_s19   ;;  %s1045_s18 = sphi %s1108_s18, %s1487_s18   ;;  %s1041_s17 = sphi %s1106_s17, %s1486_s17   ;;  %s1037_s16 = sphi %s1104_s16, %s1485_s16   ;;  %s1033_s15 = sphi %s1102_s15, %s1484_s15  }
   0xd   : > { %p57_p0 = scmp.ne.s32.totalorder %s1037_s16, %s1033_s15  ;;  %p1146_p1 = scmp.eq.s32.totalorder %s666_s23, 0 }
   0xe   : > { %p1150_p2 = scmp.eq.s32.totalorder %s666_s23, 3  ;;  %p129_p3 = scmp.eq.s32.totalorder %s667_s24, 3 }
   0xf   : > { %s1467_s25 = scalar_select %p1146_p1, 1, 0 }
  0x10   : > { %s1468_s26 = scalar_select %p1150_p2, 1, 0 }
  0x11   : > { %p1156_p4 = por %p1146_p1, %p57_p0  ;;  %p668_p5 = scmp.ge.s32.totalorder %s1061_s22, 1 }
  0x12   : > { %p1161_p6 = por %p129_p3, %p57_p0  ;;  %p162_p7 = scmp.lt.s32.totalorder %s1061_s22, 5 }
  0x13   : > { %s1469_s27 = scalar_select %p1156_p4, 1, 0 }
  0x14   : > { %s1470_s28 = scalar_select %p1161_p6, 1, 0 }
  0x15   : > { %p1166_p8 = pnand %p668_p5, %p162_p7  ;;  %s1063_s30 = smov [#allocation6]  }
  0x16   : > { %1471 = sst [smem:[#allocation16_spill]] %s1470_s28  ;;  %s174_s5 = sshll.u32 %s1063_s30, 4  ;;  %s175_s5 = int_to_ptr.vmem [resolvable:$true] %s174_s5 }
  0x17   : > { %s1472_s29 = scalar_select %p1166_p8, 1, 0 }
  0x18   : > { %p738_p9 = pneg %p1166_p8  ;;  %s1064_s7 = smov [#allocation8]  }
  0x19   : > { %s187_s8 = sshll.u32 %s1064_s7, 4  ;;  %s1474_s1 = sld [smem:[#allocation17_spill]]  ;;  %s1178_s8 = int_to_ptr.vmem [resolvable:$true] %s187_s8 }
  0x1a   : > { %p1174_p10 = pnand %p738_p9, %p1146_p1 }
  0x1c   : > { %p843_p12 = pneg %p1174_p10 }
  0x1f   : > { %s841_s11 = scalar_lea.hbm %s1474_s1, 512 }
  0x20   : > { %p842_p11 = scmp.ne.s32.totalorder %s1474_s1, %s841_s11  ;;  %p848_p3 = scmp.lt.u32.totalorder %s841_s11, %s1474_s1 }
  0x22   : > { %p844_p13 = pnand %p843_p12, %p842_p11 }
  0x24   : > { %p845_p0 = pneg %p844_p13 }
  0x26   : > { %p850_p5 = pnand %p848_p3, %p845_p0 }
  0x28   : > { %853 = shalt.err (!%p850_p5)
}
  0x29   : > { %s854_s24 = scalar_lea.vmem %s175_s5, 512  ;;  %p862_p1 = scmp.lt.s32.totalorder %s175_s5, %s175_s5 }
  0x2a   : > { %p855_p7 = scmp.ne.s32.totalorder %s175_s5, %s854_s24  ;;  %p863_p4 = scmp.lt.s32.totalorder %s854_s24, %s854_s24 }
  0x2c   : > { %p857_p9 = pnand %p855_p7, %p843_p12  ;;  %p864_p8 = por %p863_p4, %p862_p1 }
  0x2e   : > { %p858_p6 = pneg %p857_p9 }
  0x30   : > { %p865_p2 = pnand %p864_p8, %p858_p6 }
  0x32   : > { %868 = shalt.err (!%p865_p2)
}
  0x33   : > { %s1065_s30 = smov 128   ;;  %s1066_s7 = smov 8  }
  0x34   : > { %741 = dma.hbm_to_vmem [thread:$0]  (!%p1174_p10), %s1474_s1, 512, %s175_s5, [#allocation7], %s1065_s30, %s1065_s30, %s1066_s7  }
  0x35   : > { %s869_s13 = scalar_lea.hbm %s1458_s2, 512 }
  0x36   : > { %p870_p11 = scmp.ne.s32.totalorder %s1458_s2, %s869_s13  ;;  %p876_p4 = scmp.lt.u32.totalorder %s869_s13, %s1458_s2 }
  0x38   : > { %p872_p1 = pnand %p870_p11, %p843_p12 }
  0x3a   : > { %p873_p2 = pneg %p872_p1 }
  0x3c   : > { %p878_p6 = pnand %p876_p4, %p873_p2 }
  0x3e   : > { %881 = shalt.err (!%p878_p6)
}
  0x3f   : > { %s882_s5 = scalar_lea.vmem %s1178_s8, 512  ;;  %p890_p3 = scmp.lt.s32.totalorder %s1178_s8, %s1178_s8 }
  0x40   : > { %p883_p8 = scmp.ne.s32.totalorder %s1178_s8, %s882_s5  ;;  %p891_p5 = scmp.lt.s32.totalorder %s882_s5, %s882_s5 }
  0x42   : > { %p885_p13 = pnand %p883_p8, %p843_p12  ;;  %p892_p7 = por %p891_p5, %p890_p3 }
  0x44   : > { %p886_p0 = pneg %p885_p13 }
  0x46   : > { %p893_p9 = pnand %p892_p7, %p886_p0 }
  0x48   : > { %896 = shalt.err (!%p893_p9)
}
  0x49   : > { %744 = dma.hbm_to_vmem [thread:$0]  (!%p1174_p10), %s1458_s2, 512, %s1178_s8, [#allocation7], %s1065_s30, %s1065_s30, %s1066_s7  }
  0x4a   : > { %s34_s10 = sadd.s32 1, %s1053_s20  ;;  %s37_s11 = sadd.s32 1, %s1057_s21 }
  0x4b   : > { %p35_p12 = scmp.ge.s32.totalorder %s34_s10, 2  ;;  %s44_s6 = sadd.s32 1, %s1041_s17 }
  0x4c   : > { %p51_p11 = scmp.ne.s32.totalorder %s1041_s17, %s1037_s16  ;;  %p52_p1 = scmp.eq.s32.totalorder %s1061_s22, 0 }
  0x4d   : > { %s1492_s10 = smov (%p35_p12, %s34_s10), 0  ;;  %s1494_s11 = smov (!%p35_p12, %s37_s11), %s1057_s21 }
  0x4e   : > { %p1236_p2 = por %p52_p1, %p51_p11  ;;  %p1476_p4 = scmp.ne.s32.totalorder %s1468_s26, 0 }
  0x4f   : > { %p39_p10 = scmp.ge.s32.totalorder %s1494_s11, 2  ;;  %p758_p8 = scmp.lt.s32.totalorder %s1061_s22, 4 }
  0x50   : > { %p1242_p6 = por %p1476_p4, %p51_p11  ;;  %s201_s8 = sand.u32 1, %s1041_s17  }
  0x51   : > { %s697_s30 = sshll.u32 %s1057_s21, 7  ;;  %s1496_s11 = smov (%p39_p10, %s1494_s11), 0 }
  0x52   : > { %s672_s7 = sshll.u32 %s201_s8, 3  ;;  %s41_s14 = ssub.s32 %s1057_s21, %s1496_s11 }
  0x53   : > { %p42_p13 = scmp.eq.s32.totalorder %s41_s14, 0  ;;  %s1256_s5 = scalar_lea.hbm %s1456_s0, %s697_s30 }
  0x54   : > { %s205_s26 = scalar_lea.vmem [#allocation3], %s672_s7  ;;  %p1260_p0 = pnand %p758_p8, %p1236_p2 }
  0x55   : > { %s213_s28 = sshll.u32 %s205_s26, 4  ;;  %s202_s14 = scalar_lea.sflag [#allocation4], %s201_s8  ;;  %s1267_s28 = int_to_ptr.vmem [resolvable:$true] %s213_s28 }
  0x56   : > { %s1265_s1 = scalar_select %p42_p13, %s1041_s17, %s44_s6  }
  0x57   : > { %s897_s30 = scalar_lea.hbm %s1256_s5, 128  ;;  %p899_p5 = pneg %p1260_p0 }
  0x58   : > { %p898_p3 = scmp.ne.s32.totalorder %s1256_s5, %s897_s30  ;;  %s902_s23 = scalar_lea.hbm %s1456_s0, 256 }
  0x59   : > { %p903_p12 = scmp.lt.u32.totalorder %s1256_s5, %s1456_s0  ;;  %p904_p11 = scmp.lt.u32.totalorder %s902_s23, %s897_s30 }
  0x5a   : > { %p900_p7 = pnand %p899_p5, %p898_p3  ;;  %p906_p2 = scmp.lt.u32.totalorder %s897_s30, %s1256_s5 }
  0x5b   : > { %p905_p1 = por %p904_p11, %p903_p12 }
  0x5c   : > { %p901_p9 = pneg %p900_p7 }
  0x5d   : > { %p907_p4 = por %p906_p2, %p905_p1 }
  0x5f   : > { %p908_p10 = pnand %p907_p4, %p901_p9 }
  0x61   : > { %911 = shalt.err (!%p908_p10)
}
  0x62   : > { %s912_s6 = scalar_lea.vmem %s1267_s28, 128  ;;  %s1067_s8 = smov [#allocation3]  }
  0x63   : > { %p913_p8 = scmp.ne.s32.totalorder %s1267_s28, %s912_s6  ;;  %s917_s12 = sshll.u32 %s1067_s8, 4  ;;  %s918_s12 = int_to_ptr.vmem [resolvable:$false] %s917_s12 }
  0x64   : > { %s919_s7 = scalar_lea.vmem %s918_s12, 256  ;;  %p920_p7 = scmp.lt.s32.totalorder %s1267_s28, %s918_s12 }
  0x65   : > { %p915_p13 = pnand %p913_p8, %p899_p5  ;;  %p921_p12 = scmp.lt.s32.totalorder %s919_s7, %s912_s6 }
  0x67   : > { %p916_p3 = pneg %p915_p13  ;;  %p922_p11 = por %p921_p12, %p920_p7 }
  0x69   : > { %p923_p1 = pnand %p922_p11, %p916_p3 }
  0x6b   : > { %926 = shalt.err (!%p923_p1)
}
  0x6c   : > { %748 = dma.hbm_to_vmem [thread:$0]  (!%p1260_p0), %s1256_s5, 128, %s1267_s28, %s202_s14  }
  0x6d   : > { %p1479_p9 = scmp.ne.s32.totalorder %s1472_s29, 0 }
  0x6e   : > { %s1297_s30 = sand.u32 (!%p1479_p9), 1, %s1037_s16   ;;  %p1480_p5 = scmp.ne.s32.totalorder (!%p1479_p9), %s1469_s27, 0 }
  0x6f   : > { %222 = sbr.rel (%p1479_p9) target bundleno = 669 (0x29d), region = 32  ;;  %s676_s23 = sshll.u32 (!%p1479_p9), %s1297_s30, 3 }
  0x70   : > { %s225_s24 = scalar_lea.sflag (!%p1479_p9), [#allocation4], %s1297_s30  ;;  %s228_s26 = scalar_lea.vmem (!%p1479_p9), [#allocation3], %s676_s23 }
  0x76   : > { %1016 = dma.done.wait (%p1480_p5), %s225_s24, 128  }
  0x77   : > { %1018 = vsyncadd (%p1480_p5), %s225_s24, 4294967168  ;;  %p1481_p2 = scmp.ne.s32.totalorder %s1467_s25, 0 }
  0x79   : > { %1020 = dma.done.wait (%p1481_p2), [#allocation7], 1024  }
  0x7a   : > { %1022 = vsyncadd (%p1481_p2), [#allocation7], 4294966272  ;;  %s679_s29 = sshll.u32 %s1297_s30, 5  ;;  %p681_p0 = scmp.ne.s32.totalorder %s1045_s18, 0 }
  0x7b   : > { %s1310_s5 = scalar_lea.vmem [#allocation9], %s679_s29  ;;  %s1312_s28 = scalar_lea.vmem [#allocation10], %s679_s29  ;;  %v270_v0 = vld [vmem:[%s228_s26] sm:$0xff] (!%p681_p0)  ;;  %vm299_vm0 = vcmask (!%p681_p0), 7168   ;;  %v1070_v2 = vmov (!%p681_p0), 0.0   ;;  %v278_v3 = vlaneseq (!%p681_p0)  ;;  %vm292_vm3 = vcmask (!%p681_p0), 1043456  }
  0x7c   : > { %269 = sbr.rel (%p681_p0) target bundleno = 248 (0xf8), region = 48  ;;  %s1068_s25 = smov (!%p681_p0), 126   ;;  %v272_v1 = vcombine.high (!%p681_p0), %v270_v0, %v270_v0  ;;  %300 = vst.msk [vmem:[%s1310_s5] sm:$0xff] (!%p681_p0), %vm299_vm0, %v1070_v2  ;;  %301 = vst.msk [vmem:[%s1310_s5 + $0x8] sm:$0xff] (!%p681_p0), %vm299_vm0, %v1070_v2  ;;  %v290_v7 = vcombine.low (!%p681_p0), %v270_v0, %v270_v0 }
  0x7d   : > { %283 = vrot.lane.b32.xlu1 (!%p681_p0), %v270_v0, %s1068_s25  ;;  %s1069_s27 = smov (!%p681_p0), 2   ;;  %302 = vst.msk [vmem:[%s1310_s5 + $0x10] sm:$0xff] (!%p681_p0), %vm299_vm0, %v1070_v2  ;;  %303 = vst.msk [vmem:[%s1310_s5 + $0x18] sm:$0xff] (!%p681_p0), %vm299_vm0, %v1070_v2  ;;  %v279_v4 = vand.u32 (!%p681_p0), 127, %v278_v3 }
  0x7e   : > { %274 = vrot.lane.b32.xlu0 (!%p681_p0), %v270_v0, %s1069_s27  ;;  %304 = vst.msk [vmem:[%s1312_s28] sm:$0xff] (!%p681_p0), %vm299_vm0, %v1070_v2  ;;  %305 = vst.msk [vmem:[%s1312_s28 + $0x8] sm:$0xff] (!%p681_p0), %vm299_vm0, %v1070_v2 }
  0x7f   : > { %306 = vst.msk [vmem:[%s1312_s28 + $0x10] sm:$0xff] (!%p681_p0), %vm299_vm0, %v1070_v2  ;;  %307 = vst.msk [vmem:[%s1312_s28 + $0x18] sm:$0xff] (!%p681_p0), %vm299_vm0, %v1070_v2  ;;  %vm287_vm1 = vcmp.lt.s32.totalorder (!%p681_p0), %v279_v4, 126  ;;  %vm280_vm2 = vcmp.lt.s32.totalorder (!%p681_p0), %v279_v4, 2 }
  0x81   : > { %285 = vrot.lane.b32.xlu1 (!%p681_p0), %v272_v1, %s1068_s25 }
  0x82   : > { %276 = vrot.lane.b32.xlu0 (!%p681_p0), %v272_v1, %s1069_s27 }
  0xef   : > { %v284_v5 = vpop.permute.xlu1 %283 }
  0xf0   : > { %v275_v6 = vpop.permute.xlu0 %274 }
  0xf3   : > { %v286_v8 = vpop.permute.xlu1 %285 }
  0xf4   : > { %v277_v9 = vpop.permute.xlu0 %276  ;;  %v288_v10 = vsel %vm287_vm1, %v284_v5, %v286_v8  ;;  %v289_v11 = vsel %vm287_vm1, %v286_v8, %v284_v5 }
  0xf5   : > { %v281_v12 = vsel %vm280_vm2, %v275_v6, %v277_v9  ;;  %v282_v13 = vsel %vm280_vm2, %v277_v9, %v275_v6  ;;  %297 = vst [vmem:[#allocation2 + $0x10] sm:$0xf] %v288_v10  ;;  %298 = vst [vmem:[#allocation2 + $0x18] sm:$0xf] %v289_v11 }
  0xf6   : > { %v293_v14 = vsel %vm292_vm3, %v282_v13, %v290_v7  ;;  %v294_v15 = vsel %vm292_vm3, %v281_v12, %v270_v0 }
  0xf7   : > { %295 = vst [vmem:[#allocation2] sm:$0xff] %v293_v14  ;;  %296 = vst [vmem:[#allocation2 + $0x8] sm:$0xff] %v294_v15 }
  0xf8 PF: > { %s682_s9 = sshll.u32 %s1045_s18, 7  ;;  %v315_v16 = vld [vmem:[#allocation6] sm:$0xff]  ;;  %vm343_vm4 = vcmask 97280   ;;  %v317_v17 = vld [vmem:[#allocation6 + $0x10] sm:$0xff]  ;;  %vm356_vm5 = vcmask 1043456   ;;  %v1071_v18 = vmov 0  }
  0xf9   : > { %s309_s14 = sshra.s32 %s682_s9, 7  ;;  %710 = vmatprep.mubr.msk.f32.mxu0 %vm343_vm4, %v315_v16  ;;  %713 = vmatprep.mubr.msk.f32.mxu1 %vm343_vm4, %v317_v17  ;;  %v321_v19 = vld [vmem:[#allocation8 + $0x10] sm:$0xff]  ;;  %v319_v20 = vld [vmem:[#allocation8] sm:$0xff]  ;;  %vm1072_vm6 = vmmov 1   ;;  %v322_v24 = vld [vmem:[#allocation8 + $0x18] sm:$0xff]  ;;  %vm465_vm8 = vcmask 7168  }
  0xfa   : > { %s683_s6 = sshll.u32 %s309_s14, 3  ;;  %840 = vset.pattern.permute.xlu1 %v1071_v18  ;;  %839 = vset.pattern.permute.xlu0 %v1071_v18  ;;  %vm717_vm7 = vmpackc.low %vm356_vm5, %vm1072_vm6  ;;  %v320_v25 = vld [vmem:[#allocation8 + $0x8] sm:$0xff]  ;;  %v318_v27 = vld [vmem:[#allocation6 + $0x18] sm:$0xff]  ;;  %s698_s18 = sshll.u32 %s1049_s19, 9 }
  0xfb   : > { %335 = vperm.xlu1 %840, %v321_v19   ;;  %325 = vperm.xlu0 %839, %v319_v20   ;;  %s312_s8 = scalar_lea.vmem [#allocation2], %s683_s6  ;;  %v316_v26 = vld [vmem:[#allocation6 + $0x8] sm:$0xff]  ;;  %v452_v48 = vld [vmem:[%s1310_s5 + $0x18] sm:$0xff]  ;;  %v449_v54 = vld [vmem:[%s1310_s5] sm:$0xff]  ;;  %s513_s12 = sshll.u32 %s1310_s5, 4  ;;  %s1352_s12 = int_to_ptr.vmem [resolvable:$true] %s513_s12 }
  0xfc   : > { %v450_v49 = vld [vmem:[%s1310_s5 + $0x8] sm:$0xff]  ;;  %v470_v55 = vld [vmem:[%s1312_s28] sm:$0xff]  ;;  %v451_v60 = vld [vmem:[%s1310_s5 + $0x10] sm:$0xff]  ;;  %s1350_s24 = scalar_lea.hbm %s1459_s3, %s698_s18  ;;  %s495_s26 = scalar_lea.sflag [#allocation5], %s1297_s30 }
  0xfd   : > { %v472_v61 = vld [vmem:[%s1312_s28 + $0x10] sm:$0xff]  ;;  %v471_v2 = vld [vmem:[%s1312_s28 + $0x8] sm:$0xff]  ;;  %s927_s29 = scalar_lea.vmem %s1352_s12, 512  ;;  %s1073_s25 = smov [#allocation9]  }
  0xfe   : > { %v313_v21 = vld [vmem:[%s312_s8] sm:$0xff]  ;;  %v314_v22 = vld [vmem:[%s312_s8 + $0x10] sm:$0xf]  ;;  %p928_p4 = scmp.ne.s32.totalorder %s1352_s12, %s927_s29  ;;  %s931_s27 = sshll.u32 %s1073_s25, 4  ;;  %s932_s27 = int_to_ptr.vmem [resolvable:$false] %s931_s27 }
  0xff   : > { %v716_v23 = vpack.c.bf16 %v314_v22, %v313_v21  ;;  %340 = vperm.xlu1 %840, %v322_v24   ;;  %330 = vperm.xlu0 %839, %v320_v25   ;;  %s933_s9 = scalar_lea.vmem %s932_s27, 1024  ;;  %p934_p13 = scmp.lt.s32.totalorder %s1352_s12, %s932_s27 }
 0x100   : > { %p929_p10 = pnand %p928_p4, %p1242_p6  ;;  %p935_p3 = scmp.lt.s32.totalorder %s933_s9, %s927_s29 }
 0x101   : > { %718 = vmatprep.subr.msk.bf16.mxu0 %vm717_vm7, %v716_v23  ;;  %722 = vmatprep.subr.msk.bf16.mxu1 %vm717_vm7, %v716_v23 }
 0x102   : > { %721 = vmatpush3.bf16.msk.msra.mxu0 %vm717_vm7, %v716_v23  ;;  %723 = vmatpush3.bf16.msk.msra.mxu1 %vm717_vm7, %v716_v23  ;;  %p930_p8 = pneg %p929_p10  ;;  %p936_p7 = por %p935_p3, %p934_p13 }
 0x104   : > { %p937_p12 = pnand %p936_p7, %p930_p8 }
 0x105   : > { %711 = vmatmul.mubr.msk.f32.vlgmr.msra.gmra.mrb[0].mxu0 %vm343_vm4, %v316_v26  ;;  %714 = vmatmul.mubr.msk.f32.vlgmr.msra.gmra.mrb[0].mxu1 %vm343_vm4, %v318_v27 }
 0x17a   : > { %v326_v28 = vpop.permute.xlu0 %325  ;;  %v336_v29 = vpop.permute.xlu1 %335 }
 0x17e   : > { %v331_v30 = vpop.permute.xlu0 %330  ;;  %v341_v31 = vpop.permute.xlu1 %340 }
 0x1d8   : > { %v712_v32 = vpop.f32.mrb[0].mxu0  ;;  %v715_v33 = vpop.f32.mrb[0].mxu1 }
 0x1d9   : > { %v432_v34 = vadd.f32 %v712_v32, %v331_v30  ;;  %v442_v35 = vadd.f32 %v715_v33, %v341_v31  ;;  %v436_v36 = vpop.f32.mrb[1].mxu1  ;;  %v426_v37 = vpop.f32.mrb[1].mxu0 }
 0x1da   : > { %v427_v38 = vadd.f32 %v426_v37, %v326_v28  ;;  %v437_v41 = vadd.f32 %v436_v36, %v336_v29 }
 0x1db   : > { %v446_v39 = vmax.f32 %v432_v34, 0.0  ;;  %v448_v40 = vmax.f32 %v442_v35, 0.0 }
 0x1dc   : > { %v445_v42 = vmax.f32 %v427_v38, 0.0  ;;  %v447_v44 = vmax.f32 %v437_v41, 0.0 }
 0x1dd   : > { %459 = vadd.xlane.f32.xlu0 %v448_v40  ;;  %455 = vadd.xlane.f32.xlu1 %v446_v39  ;;  %v475_v46 = vmul.f32 %v446_v39, %v446_v39  ;;  %v477_v47 = vmul.f32 %v448_v40, %v448_v40 }
 0x1de   : > { %v474_v43 = vmul.f32 %v445_v42, %v445_v42  ;;  %v476_v45 = vmul.f32 %v447_v44, %v447_v44 }
 0x1e1   : > { %453 = vadd.xlane.f32.xlu0 %v445_v42  ;;  %478 = vadd.xlane.f32.xlu1 %v474_v43 }
 0x1e5   : > { %457 = vadd.xlane.f32.xlu0 %v447_v44  ;;  %482 = vadd.xlane.f32.xlu1 %v476_v45 }
 0x1e9   : > { %480 = vadd.xlane.f32.xlu0 %v475_v46 }
 0x1ed   : > { %484 = vadd.xlane.f32.xlu0 %v477_v47 }
 0x26a   : > { %v460_v50 = vpop.xlane.xlu0 %459  ;;  %v456_v51 = vpop.xlane.xlu1 %455 }
 0x26b   : > { %v464_v52 = vadd.f32 %v460_v50, %v452_v48  ;;  %v462_v53 = vadd.f32 %v456_v51, %v450_v49 }
 0x26d   : > { %469 = vst.msk [vmem:[%s1310_s5 + $0x18] sm:$0xff] %vm465_vm8, %v464_v52  ;;  %467 = vst.msk [vmem:[%s1310_s5 + $0x8] sm:$0xff] %vm465_vm8, %v462_v53 }
 0x26e   : > { %v454_v56 = vpop.xlane.xlu0 %453  ;;  %v479_v57 = vpop.xlane.xlu1 %478 }
 0x26f   : > { %v461_v58 = vadd.f32 %v454_v56, %v449_v54  ;;  %v486_v59 = vadd.f32 %v479_v57, %v470_v55 }
 0x271   : > { %466 = vst.msk [vmem:[%s1310_s5] sm:$0xff] %vm465_vm8, %v461_v58  ;;  %490 = vst.msk [vmem:[%s1312_s28] sm:$0xff] %vm465_vm8, %v486_v59 }
 0x272   : > { %v458_v62 = vpop.xlane.xlu0 %457  ;;  %v483_v63 = vpop.xlane.xlu1 %482 }
 0x273   : > { %v463_v0 = vadd.f32 %v458_v62, %v451_v60  ;;  %v488_v1 = vadd.f32 %v483_v63, %v472_v61 }
 0x275   : > { %468 = vst.msk [vmem:[%s1310_s5 + $0x10] sm:$0xff] %vm465_vm8, %v463_v0  ;;  %492 = vst.msk [vmem:[%s1312_s28 + $0x10] sm:$0xff] %vm465_vm8, %v488_v1 }
 0x276   : > { %v481_v3 = vpop.xlane.xlu0 %480 }
 0x277   : > { %940 = shalt.err (!%p937_p12)
}
 0x278   : > { %s941_s5 = scalar_lea.hbm %s1350_s24, 512  ;;  %s945_s8 = scalar_lea.hbm %s1459_s3, 1024 }
 0x279   : > { %p942_p11 = scmp.ne.s32.totalorder %s1350_s24, %s941_s5  ;;  %p946_p5 = scmp.lt.u32.totalorder %s1350_s24, %s1459_s3 }
 0x27a   : > { %p947_p2 = scmp.lt.u32.totalorder %s945_s8, %s941_s5  ;;  %p949_p4 = scmp.lt.u32.totalorder %s941_s5, %s1350_s24 }
 0x27b   : > { %p943_p1 = pnand %p942_p11, %p1242_p6 }
 0x27c   : > { %p948_p0 = por %p947_p2, %p946_p5 }
 0x27d   : > { %p944_p9 = pneg %p943_p1 }
 0x27e   : > { %p950_p10 = por %p949_p4, %p948_p0 }
 0x280   : > { %p951_p8 = pnand %p950_p10, %p944_p9 }
 0x282   : > { %954 = shalt.err (!%p951_p8)
}
 0x283   : > { %s1074_s29 = smov 128   ;;  %s1075_s25 = smov 8   ;;  %v487_v4 = vadd.f32 %v481_v3, %v471_v2  ;;  %v473_v5 = vld [vmem:[%s1312_s28 + $0x18] sm:$0xff]  ;;  %v485_v6 = vpop.xlane.xlu0 %484 }
 0x284   : > { %734 = dma.vmem_to_hbm [thread:$0]  (%p1242_p6), %s1352_s12, 512, %s1350_s24, %s495_s26, %s1074_s29, %s1074_s29, %s1075_s25   ;;  %v489_v7 = vadd.f32 %v485_v6, %v473_v5 }
 0x285   : > { %s529_s27 = sshll.u32 %s1312_s28, 4  ;;  %491 = vst.msk [vmem:[%s1312_s28 + $0x8] sm:$0xff] %vm465_vm8, %v487_v4  ;;  %s1395_s14 = scalar_lea.hbm %s1460_s4, %s698_s18  ;;  %s1397_s27 = int_to_ptr.vmem [resolvable:$true] %s529_s27 }
 0x286   : > { %493 = vst.msk [vmem:[%s1312_s28 + $0x18] sm:$0xff] %vm465_vm8, %v489_v7  ;;  %s500_s12 = scalar_lea.sflag [#allocation11], %s1297_s30  ;;  %s955_s24 = scalar_lea.vmem %s1397_s27, 512 }
 0x287   : > { %p956_p13 = scmp.ne.s32.totalorder %s1397_s27, %s955_s24  ;;  %s1076_s26 = smov [#allocation10]  }
 0x288   : > { %s959_s19 = sshll.u32 %s1076_s26, 4  ;;  %s960_s19 = int_to_ptr.vmem [resolvable:$false] %s959_s19 }
 0x289   : > { %p957_p3 = pnand %p956_p13, %p1242_p6  ;;  %s961_s6 = scalar_lea.vmem %s960_s19, 1024 }
 0x28a   : > { %p962_p12 = scmp.lt.s32.totalorder %s1397_s27, %s960_s19  ;;  %p963_p11 = scmp.lt.s32.totalorder %s961_s6, %s955_s24 }
 0x28b   : > { %p958_p7 = pneg %p957_p3 }
 0x28c   : > { %p964_p1 = por %p963_p11, %p962_p12 }
 0x28e   : > { %p965_p9 = pnand %p964_p1, %p958_p7 }
 0x290   : > { %968 = shalt.err (!%p965_p9)
}
 0x291   : > { %s969_s28 = scalar_lea.hbm %s1395_s14, 512  ;;  %s973_s7 = scalar_lea.hbm %s1460_s4, 1024 }
 0x292   : > { %p970_p5 = scmp.ne.s32.totalorder %s1395_s14, %s969_s28  ;;  %p974_p4 = scmp.lt.u32.totalorder %s1395_s14, %s1460_s4 }
 0x293   : > { %p975_p10 = scmp.lt.u32.totalorder %s973_s7, %s969_s28  ;;  %p977_p13 = scmp.lt.u32.totalorder %s969_s28, %s1395_s14 }
 0x294   : > { %p971_p2 = pnand %p970_p5, %p1242_p6 }
 0x295   : > { %p976_p8 = por %p975_p10, %p974_p4 }
 0x296   : > { %p972_p0 = pneg %p971_p2 }
 0x297   : > { %p978_p3 = por %p977_p13, %p976_p8 }
 0x299   : > { %p979_p7 = pnand %p978_p3, %p972_p0 }
 0x29b   : > { %982 = shalt.err (!%p979_p7)
}
 0x29c   : > { %735 = dma.vmem_to_hbm [thread:$0]  (%p1242_p6), %s1397_s27, 512, %s1395_s14, %s500_s12, %s1074_s29, %s1074_s29, %s1075_s25  }
 0x29d PF: > { %s1482_s5 = sld [smem:[#allocation16_spill]]  ;;  %p761_p12 = scmp.ge.s32.totalorder %s1061_s22, 2 }
 0x29e   : > { %s544_s24 = sand.u32 1, %s1033_s15  }
 0x29f   : > { %s545_s26 = scalar_lea.sflag [#allocation5], %s544_s24 }
 0x2a3   : > { %p1483_p11 = scmp.ne.s32.totalorder %s1482_s5, 0 }
 0x2a5   : > { %p750_p1 = pnand %p761_p12, %p1483_p11 }
 0x2a7   : > { %1024 = dma.done.wait (!%p750_p1), %s545_s26, 512  }
 0x2a8   : > { %1026 = vsyncadd (!%p750_p1), %s545_s26, 4294966784  ;;  %s554_s13 = scalar_lea.sflag [#allocation11], %s544_s24 }
 0x2a9   : > { %1028 = dma.done.wait (!%p750_p1), %s554_s13, 512  }
 0x2aa   : > { %1030 = vsyncadd (!%p750_p1), %s554_s13, 4294966784  ;;  %s25_s22 = sadd.s32 1, %s1061_s22   ;;  %s1484_s15 = smov %s1037_s16 }
 0x2ab   : > { %p22_p9 = scmp.ge.s32.totalorder %s25_s22, 6   ;;  %s1485_s16 = smov %s1041_s17 }
 0x2ac   : > { %s1486_s17 = smov %s1265_s1  ;;  %s1487_s18 = smov %s1053_s20 }
 0x2ad   : > { %s1488_s19 = smov %s1057_s21  ;;  %s1489_s20 = smov %s1492_s10 }
 0x2ae   : > { %s1490_s21 = smov %s1496_s11  ;;  %24 = sbr.rel (!%p22_p9) target bundleno = 12 (0xc), region = 107 }
 0x2b5   :  { %559 = vsyncpa [#allocation4], 1 }
 0x2b6   :  { %561 = vsyncpa [#allocation4 + $0x1], 1 }
 0x2b7   :  { %562 = vsyncpa [#allocation7], 1 }
 0x2b8   :  { %563 = vsyncpa [#allocation5], 1 }
 0x2b9   :  { %565 = vsyncpa [#allocation5 + $0x1], 1 }
 0x2ba   :  { %566 = vsyncpa [#allocation11], 1 }
 0x2bb   :  { %568 = vsyncpa [#allocation11 + $0x1], 1 }

</bundles_post_ra>
